<compile_context>
chip_gen: v6e
topology: v6e:2x2x1
jax: 0.10.0
libtpu: 0.0.40
codegen_flags: <defaults>
</compile_context>

<pallas_src>
import functools

import jax
import jax.numpy as jnp
from jax.experimental import pallas as pl
from jax.experimental.pallas import tpu as pltpu


def _round_up(n, m):
    return ((n + m - 1) // m) * m


def _pick_tile(n, target, align):
    """Largest `align`-aligned divisor of n that is <= target (n is align-padded)."""
    if n <= target:
        return n
    for t in range(min(target, n), 0, -1):
        if n % t == 0 and t % align == 0:
            return t
    return n  # unreachable when n is a multiple of `align`


def _vmem_budget_bytes():
    """~75% of per-core VMEM: ~48 MiB on v7x, ~96 MiB on v5e/v6e."""
    try:
        cap = int(pltpu.get_tpu_info().vmem_capacity_bytes)
    except Exception:
        cap = 64 * 1024 * 1024  # conservative (v7x-sized) fallback
    return min(int(cap * 0.75), 112 * 1024 * 1024)


def _gcn_kernel(*refs, aggregate_first):
    """One (batch, row-tile, k-tile) grid step.

    aggregate_first=True : refs = adj, x, W^T, bias, out, acc, deg
                           acc += adj_tile @ x_tile; finalize: (acc @ W)/deg + b
    aggregate_first=False: refs = adj, proj, bias, out, acc, deg
                           acc += adj_tile @ proj_tile; finalize: acc/deg + b
    """
    if aggregate_first:
        adj_ref, feat_ref, w_ref, b_ref, o_ref, acc_ref, deg_ref = refs
    else:
        adj_ref, feat_ref, b_ref, o_ref, acc_ref, deg_ref = refs
        w_ref = None

    k = pl.program_id(2)

    adj = adj_ref[0]                        # (TM, TK), compute dtype (pre-cast in wrapper)
    feat = feat_ref[0]                      # (TK, d_feat), compute dtype

    part_acc = jnp.dot(adj, feat, preferred_element_type=jnp.float32)
    part_deg = jnp.sum(adj.astype(jnp.float32), axis=-1, keepdims=True)

    @pl.when(k == 0)
    def _first():                           # assign (no zero-init read-modify-write)
        acc_ref[...] = part_acc
        deg_ref[...] = part_deg

    @pl.when(k > 0)
    def _accumulate():
        acc_ref[...] += part_acc
        deg_ref[...] += part_deg

    @pl.when(k == pl.num_programs(2) - 1)
    def _finalize():
        # NOTE: rows with zero degree produce inf/NaN, exactly like the PyTorch
        # reference; padded rows are sliced off by the wrapper.
        inv_deg = pl.reciprocal(deg_ref[...], approx=False)          # (TM, 1)
        if aggregate_first:
            # Keep the once-per-row-tile projection in f32 (no accumulator downcast).
            feat_out = jnp.dot(acc_ref[...], w_ref[...].astype(jnp.float32),
                               preferred_element_type=jnp.float32)   # (TM, d_out_pad)
        else:
            feat_out = acc_ref[...]
        o_ref[0] = (feat_out * inv_deg
                    + b_ref[...].astype(jnp.float32)).astype(o_ref.dtype)


def gcn_layer(x, adj_hat, weight, bias, *, tm_target=512, tk_target=2048,
              compute_dtype=jnp.bfloat16, aggregate_first=None,
              vmem_limit_bytes=None):
    """x: (B, N, d_in), adj_hat: (B, N, N), weight: (d_out, d_in), bias: (d_out,)."""
    B, N, d_in = x.shape
    d_out = weight.shape[0]
    out_dtype = x.dtype

    # Lane-dense output features: pad d_out up to a multiple of 128.
    d_out_pad = _round_up(d_out, 128)

    # Cheaper ordering: the dominant O(B*N^2) matmul streams the narrower feature width.
    if aggregate_first is None:
        aggregate_first = d_in <= d_out_pad
    d_feat = d_in if aggregate_first else d_out_pad        # streamed feature width
    d_acc = d_feat                                         # accumulator width

    # Pad N to a multiple of 128 so the tiled path is always taken.
    n_pad = _round_up(N, 128)
    pad_n = n_pad - N

    # Wrapper-side casts (no per-tile casts in the kernel). bf16 is exact for 0/1 adj.
    adj_c = adj_hat if compute_dtype is None else adj_hat.astype(compute_dtype)
    adj_c = jnp.pad(adj_c, ((0, 0), (0, pad_n), (0, pad_n)))

    if aggregate_first:
        feat = x if compute_dtype is None else x.astype(compute_dtype)
    else:
        # Hoist the projection out of the kernel: computed once here (XLA matmul).
        proj = jnp.einsum("bni,oi->bno", x.astype(jnp.float32),
                          weight.astype(jnp.float32))
        proj = jnp.pad(proj, ((0, 0), (0, 0), (0, d_out_pad - d_out)))
        feat = proj.astype(out_dtype if compute_dtype is None else compute_dtype)
    feat = jnp.pad(feat, ((0, 0), (0, pad_n), (0, 0)))

    w_t = jnp.pad(weight.astype(jnp.float32).T,
                  ((0, 0), (0, d_out_pad - d_out)))                      # (d_in, d_out_pad)
    b2d = jnp.pad(bias.astype(jnp.float32),
                  (0, d_out_pad - d_out)).reshape(1, d_out_pad)          # (1, d_out_pad)

    adj_bytes = jnp.dtype(adj_c.dtype).itemsize
    feat_bytes = jnp.dtype(feat.dtype).itemsize
    out_bytes = jnp.dtype(out_dtype).itemsize

    vmem_budget = _vmem_budget_bytes() if vmem_limit_bytes is None else vmem_limit_bytes

    def _vmem_usage(tm_, tk_):
        use = 2 * tm_ * tk_ * adj_bytes                  # adj double buffer
        use += 2 * tk_ * d_feat * feat_bytes             # feature double buffer
        use += 2 * tm_ * d_out_pad * out_bytes           # output double buffer
        use += tm_ * d_acc * 4 + tm_ * 128 * 4           # f32 acc + deg scratch
        if aggregate_first:
            use += 2 * d_in * d_out_pad * 4 + 2 * 128 * 4    # W^T + bias buffers
        return use

    # Largest aligned tiles <= targets that fit the VMEM budget.
    tm_t = max(8, tm_target)
    tk_t = max(128, tk_target)
    while True:
        tm = _pick_tile(n_pad, tm_t, 8)          # row tile (sublane-aligned)
        tk = _pick_tile(n_pad, tk_t, 128)        # K tile   (lane-aligned)
        if _vmem_usage(tm, tk) <= vmem_budget or (tm_t <= 8 and tk_t <= 128):
            break
        if tk_t > 128:
            tk_t //= 2
        else:
            tm_t = max(8, tm_t // 2)

    n_m, n_k = n_pad // tm, n_pad // tk

    flops = 2 * B * n_pad * n_pad * d_feat
    if aggregate_first:
        flops += 2 * B * n_pad * d_in * d_out_pad
    bytes_accessed = (B * n_pad * n_pad * adj_bytes
                      + n_m * B * n_pad * d_feat * feat_bytes   # feat re-fetched per row tile
                      + B * n_pad * d_out_pad * out_bytes
                      + (d_in * d_out_pad * 4 if aggregate_first else 0)
                      + d_out_pad * 4)
    cost = pl.CostEstimate(flops=flops, transcendentals=B * n_pad,
                           bytes_accessed=bytes_accessed)

    adj_spec = pl.BlockSpec((1, tm, tk), lambda b, m, k: (b, m, k))
    feat_spec = pl.BlockSpec((1, tk, d_feat), lambda b, m, k: (b, k, 0))
    bias_spec = pl.BlockSpec((1, d_out_pad), lambda b, m, k: (0, 0))
    if aggregate_first:
        in_specs = [adj_spec, feat_spec,
                    pl.BlockSpec((d_in, d_out_pad), lambda b, m, k: (0, 0)),
                    bias_spec]
        operands = (adj_c, feat, w_t, b2d)
    else:
        in_specs = [adj_spec, feat_spec, bias_spec]
        operands = (adj_c, feat, b2d)

    kernel = functools.partial(_gcn_kernel, aggregate_first=aggregate_first)

    out = pl.pallas_call(
        kernel,
        out_shape=jax.ShapeDtypeStruct((B, n_pad, d_out_pad), out_dtype),
        grid_spec=pltpu.PrefetchScalarGridSpec(
            num_scalar_prefetch=0,
            grid=(B, n_m, n_k),
            in_specs=in_specs,
            out_specs=pl.BlockSpec((1, tm, d_out_pad), lambda b, m, k: (b, m, 0)),
            scratch_shapes=[
                pltpu.VMEM((tm, d_acc), jnp.float32),   # aggregation accumulator
                pltpu.VMEM((tm, 1), jnp.float32),       # row-degree accumulator
            ],
        ),
        compiler_params=pltpu.CompilerParams(
            dimension_semantics=("parallel", "parallel", "arbitrary"),
            vmem_limit_bytes=vmem_budget,
        ),
        cost_estimate=cost,
    )(*operands)

    return out[:, :N, :d_out]


def gcn_ref(x, adj_hat, weight, bias):
    x32 = x.astype(jnp.float32)
    a32 = adj_hat.astype(jnp.float32)
    proj = jnp.einsum("bni,oi->bno", x32, weight.astype(jnp.float32)) \
        + bias.astype(jnp.float32)
    agg = jnp.einsum("bnm,bmo->bno", a32, proj)
    return agg / jnp.sum(a32, axis=-1, keepdims=True)


def _make_inputs(key, B, N, d_in, d_out):
    kx, ka, kw, kb = jax.random.split(key, 4)
    x = jax.random.normal(kx, (B, N, d_in), dtype=jnp.float32)
    adj = (jax.random.uniform(ka, (B, N, N)) > 0.5).astype(jnp.float32)
    adj_hat = jnp.clip(adj + jnp.eye(N, dtype=jnp.float32)[None], 0.0, 1.0)
    bound = 1.0 / (d_in ** 0.5)
    weight = jax.random.uniform(kw, (d_out, d_in), minval=-bound, maxval=bound,
                                dtype=jnp.float32)
    bias = jax.random.uniform(kb, (d_out,), minval=-bound, maxval=bound,
                              dtype=jnp.float32)
    return x, adj_hat, weight, bias


if __name__ == "__main__":
    key = jax.random.PRNGKey(0)
    k1, k2, k3 = jax.random.split(key, 3)

    # 1) Small config matching the module (N padded 8 -> 128); exact f32 path,
    #    plus the default bf16 path on the same inputs.
    B, N, d_in, d_out = 2, 8, 16, 32
    x, adj_hat, weight, bias = _make_inputs(k1, B, N, d_in, d_out)
    ref = gcn_ref(x, adj_hat, weight, bias)
    out = jax.block_until_ready(gcn_layer(x, adj_hat, weight, bias, compute_dtype=None))
    assert out.shape == (B, N, d_out)
    assert jnp.allclose(out, ref, atol=1e-5, rtol=1e-5)
    out_bf = jax.block_until_ready(gcn_layer(x, adj_hat, weight, bias))
    assert jnp.allclose(out_bf, ref, atol=5e-2, rtol=5e-2)

    # 2) Tiled grid (2 row tiles x 2 K tiles per batch), project-first path
    #    (projection precomputed in the wrapper, streamed into the kernel).
    B2, N2, d_in2, d_out2 = 2, 256, 32, 16
    x2, adj2, w2, b2 = _make_inputs(k2, B2, N2, d_in2, d_out2)
    ref2 = gcn_ref(x2, adj2, w2, b2)
    out2 = jax.block_until_ready(
        gcn_layer(x2, adj2, w2, b2, tm_target=128, tk_target=128,
                  compute_dtype=None, aggregate_first=False))
    assert out2.shape == (B2, N2, d_out2)
    assert jnp.allclose(out2, ref2, atol=1e-4, rtol=1e-4)

    # 3) Default settings: bf16 adjacency/features, auto ordering, large tiles.
    out3 = jax.block_until_ready(gcn_layer(x2, adj2, w2, b2))
    assert out3.shape == (B2, N2, d_out2)
    assert jnp.allclose(out3, ref2, atol=5e-2, rtol=5e-2)

    # 4) Non-128-multiple N exercises the wrapper-side padding path (f32 exact).
    B4, N4, d_in4, d_out4 = 2, 200, 32, 16
    x4, adj4, w4, b4 = _make_inputs(k3, B4, N4, d_in4, d_out4)
    ref4 = gcn_ref(x4, adj4, w4, b4)
    out4 = jax.block_until_ready(gcn_layer(x4, adj4, w4, b4, compute_dtype=None))
    assert out4.shape == (B4, N4, d_out4)
    assert jnp.allclose(out4, ref4, atol=1e-4, rtol=1e-4)

    print("KERNEL_OK")
</pallas_src>

<mosaic_0001>
module attributes {stable_mosaic.version = 11 : i64} {
  func.func @_gcn_kernel(%arg0: i32, %arg1: i32, %arg2: i32, %arg3: memref<1x128x128xf32, #tpu.memory_space<vmem>>, %arg4: memref<1x128x16xf32, #tpu.memory_space<vmem>>, %arg5: memref<16x128xf32, #tpu.memory_space<vmem>>, %arg6: memref<1x128xf32, #tpu.memory_space<vmem>>, %arg7: memref<1x128x128xf32, #tpu.memory_space<vmem>>, %arg8: memref<128x16xf32, #tpu.memory_space<vmem>>, %arg9: memref<128x1xf32, #tpu.memory_space<vmem>>) attributes {dimension_semantics = [#tpu.dimension_semantics<parallel>, #tpu.dimension_semantics<parallel>, #tpu.dimension_semantics<arbitrary>], iteration_bounds = array<i64: 2, 1, 1>, scalar_prefetch = 0 : i64, scratch_operands = 2 : i64, tpu.core_type = #tpu.core_type<tc>, window_params = [{transform_indices = @transform_0, window_bounds = array<i64: 1, 128, 128>}, {transform_indices = @transform_1, window_bounds = array<i64: 1, 128, 16>}, {pipeline_mode = #tpu.pipeline_mode<synchronous>, transform_indices = @transform_2, window_bounds = array<i64: 16, 128>}, {pipeline_mode = #tpu.pipeline_mode<synchronous>, transform_indices = @transform_3, window_bounds = array<i64: 1, 128>}, {transform_indices = @transform_4, window_bounds = array<i64: 1, 128, 128>}]} {
    %c0 = arith.constant 0 : index
    %c0_0 = arith.constant 0 : index
    %c0_1 = arith.constant 0 : index
    %0 = vector.load %arg3[%c0, %c0_0, %c0_1] : memref<1x128x128xf32, #tpu.memory_space<vmem>>, vector<1x128x128xf32>
    %1 = vector.shape_cast %0 : vector<1x128x128xf32> to vector<128x128xf32>
    %c0_2 = arith.constant 0 : index
    %c0_3 = arith.constant 0 : index
    %c0_4 = arith.constant 0 : index
    %2 = vector.load %arg4[%c0_2, %c0_3, %c0_4] : memref<1x128x16xf32, #tpu.memory_space<vmem>>, vector<1x128x16xf32>
    %3 = vector.shape_cast %2 : vector<1x128x16xf32> to vector<128x16xf32>
    %cst = arith.constant dense<0.000000e+00> : vector<128x16xf32>
    %4 = tpu.matmul %1, %3, %cst {dimension_numbers = #tpu.dot_dimension_numbers<[1], [0], [0], [1], [0, 0, 1, 1], [], []>} : vector<128x128xf32>, vector<128x16xf32>, vector<128x16xf32> -> vector<128x16xf32>
    %cst_5 = arith.constant dense<0.000000e+00> : vector<128xf32>
    %5 = vector.multi_reduction <add>, %1, %cst_5 [1] : vector<128x128xf32> to vector<128xf32>
    %6 = vector.shape_cast %5 : vector<128xf32> to vector<128x1xf32>
    %c0_i32 = arith.constant 0 : i32
    %7 = arith.cmpi eq, %arg2, %c0_i32 : i32
    %8 = arith.extui %7 : i1 to i32
    %c0_i32_6 = arith.constant 0 : i32
    %9 = arith.cmpi ne, %8, %c0_i32_6 : i32
    scf.if %9 {
      %c0_11 = arith.constant 0 : index
      %c0_12 = arith.constant 0 : index
      %16 = vector.load %arg8[%c0_11, %c0_12] : memref<128x16xf32, #tpu.memory_space<vmem>>, vector<128x16xf32>
      tpu.vector_store %arg8[%c0_11, %c0_12], %4 {strides = array<i32>} : memref<128x16xf32, #tpu.memory_space<vmem>>, vector<128x16xf32>,
      %c0_13 = arith.constant 0 : index
      %c0_14 = arith.constant 0 : index
      %17 = vector.load %arg9[%c0_13, %c0_14] : memref<128x1xf32, #tpu.memory_space<vmem>>, vector<128x1xf32>
      tpu.vector_store %arg9[%c0_13, %c0_14], %6 {strides = array<i32>} : memref<128x1xf32, #tpu.memory_space<vmem>>, vector<128x1xf32>,
    } else {
    }
    %c0_i32_7 = arith.constant 0 : i32
    %10 = arith.cmpi sgt, %arg2, %c0_i32_7 : i32
    %11 = arith.extui %10 : i1 to i32
    %c0_i32_8 = arith.constant 0 : i32
    %12 = arith.cmpi ne, %11, %c0_i32_8 : i32
    scf.if %12 {
      %c0_11 = arith.constant 0 : index
      %c0_12 = arith.constant 0 : index
      %16 = vector.load %arg8[%c0_11, %c0_12] : memref<128x16xf32, #tpu.memory_space<vmem>>, vector<128x16xf32>
      %17 = arith.addf %16, %4 : vector<128x16xf32>
      %c0_13 = arith.constant 0 : index
      %c0_14 = arith.constant 0 : index
      %18 = vector.load %arg8[%c0_13, %c0_14] : memref<128x16xf32, #tpu.memory_space<vmem>>, vector<128x16xf32>
      tpu.vector_store %arg8[%c0_13, %c0_14], %17 {strides = array<i32>} : memref<128x16xf32, #tpu.memory_space<vmem>>, vector<128x16xf32>,
      %c0_15 = arith.constant 0 : index
      %c0_16 = arith.constant 0 : index
      %19 = vector.load %arg9[%c0_15, %c0_16] : memref<128x1xf32, #tpu.memory_space<vmem>>, vector<128x1xf32>
      %20 = arith.addf %19, %6 : vector<128x1xf32>
      %c0_17 = arith.constant 0 : index
      %c0_18 = arith.constant 0 : index
      %21 = vector.load %arg9[%c0_17, %c0_18] : memref<128x1xf32, #tpu.memory_space<vmem>>, vector<128x1xf32>
      tpu.vector_store %arg9[%c0_17, %c0_18], %20 {strides = array<i32>} : memref<128x1xf32, #tpu.memory_space<vmem>>, vector<128x1xf32>,
    } else {
    }
    %c0_i32_9 = arith.constant 0 : i32
    %13 = arith.cmpi eq, %arg2, %c0_i32_9 : i32
    %14 = arith.extui %13 : i1 to i32
    %c0_i32_10 = arith.constant 0 : i32
    %15 = arith.cmpi ne, %14, %c0_i32_10 : i32
    scf.if %15 {
      %c0_11 = arith.constant 0 : index
      %c0_12 = arith.constant 0 : index
      %16 = vector.load %arg9[%c0_11, %c0_12] : memref<128x1xf32, #tpu.memory_space<vmem>>, vector<128x1xf32>
      %17 = tpu.reciprocal %16 : vector<128x1xf32> -> vector<128x1xf32>
      %c0_13 = arith.constant 0 : index
      %c0_14 = arith.constant 0 : index
      %18 = vector.load %arg8[%c0_13, %c0_14] : memref<128x16xf32, #tpu.memory_space<vmem>>, vector<128x16xf32>
      %c0_15 = arith.constant 0 : index
      %c0_16 = arith.constant 0 : index
      %19 = vector.load %arg5[%c0_15, %c0_16] : memref<16x128xf32, #tpu.memory_space<vmem>>, vector<16x128xf32>
      %cst_17 = arith.constant dense<0.000000e+00> : vector<128x128xf32>
      %20 = tpu.matmul %18, %19, %cst_17 {dimension_numbers = #tpu.dot_dimension_numbers<[1], [0], [0], [1], [0, 0, 1, 1], [], []>} : vector<128x16xf32>, vector<16x128xf32>, vector<128x128xf32> -> vector<128x128xf32>
      %21 = vector.broadcast %17 : vector<128x1xf32> to vector<128x128xf32>
      %22 = arith.mulf %20, %21 : vector<128x128xf32>
      %c0_18 = arith.constant 0 : index
      %c0_19 = arith.constant 0 : index
      %23 = vector.load %arg6[%c0_18, %c0_19] : memref<1x128xf32, #tpu.memory_space<vmem>>, vector<1x128xf32>
      %24 = vector.broadcast %23 : vector<1x128xf32> to vector<128x128xf32>
      %25 = arith.addf %22, %24 : vector<128x128xf32>
      %c0_20 = arith.constant 0 : index
      %c0_21 = arith.constant 0 : index
      %c0_22 = arith.constant 0 : index
      %26 = vector.load %arg7[%c0_20, %c0_21, %c0_22] : memref<1x128x128xf32, #tpu.memory_space<vmem>>, vector<1x128x128xf32>
      %27 = vector.shape_cast %26 : vector<1x128x128xf32> to vector<128x128xf32>
      %28 = vector.shape_cast %25 : vector<128x128xf32> to vector<1x128x128xf32>
      tpu.vector_store %arg7[%c0_20, %c0_21, %c0_22], %28 {strides = array<i32>} : memref<1x128x128xf32, #tpu.memory_space<vmem>>, vector<1x128x128xf32>,
    } else {
    }
    return
  }
  func.func @transform_0(%arg0: i32, %arg1: i32, %arg2: i32) -> (i32, i32, i32) {
    %c0_i32 = arith.constant 0 : i32
    return %arg0, %arg1, %arg2 : i32, i32, i32
  }
  func.func @transform_1(%arg0: i32, %arg1: i32, %arg2: i32) -> (i32, i32, i32) {
    %c0_i32 = arith.constant 0 : i32
    %c0_i32_0 = arith.constant 0 : i32
    return %arg0, %arg2, %c0_i32 : i32, i32, i32
  }
  func.func @transform_2(%arg0: i32, %arg1: i32, %arg2: i32) -> (i32, i32) {
    %c0_i32 = arith.constant 0 : i32
    %c0_i32_0 = arith.constant 0 : i32
    %c0_i32_1 = arith.constant 0 : i32
    return %c0_i32, %c0_i32_0 : i32, i32
  }
  func.func @transform_3(%arg0: i32, %arg1: i32, %arg2: i32) -> (i32, i32) {
    %c0_i32 = arith.constant 0 : i32
    %c0_i32_0 = arith.constant 0 : i32
    %c0_i32_1 = arith.constant 0 : i32
    return %c0_i32, %c0_i32_0 : i32, i32
  }
  func.func @transform_4(%arg0: i32, %arg1: i32, %arg2: i32) -> (i32, i32, i32) {
    %c0_i32 = arith.constant 0 : i32
    %c0_i32_0 = arith.constant 0 : i32
    return %arg0, %arg1, %c0_i32 : i32, i32, i32
  }
}

</mosaic_0001>

<bundles_post_ra>
// kernel: tpu_custom_call.1
= control target key start
LH: loop header
LB: loop body
LE: loop exit
PB: predicated region body
PF: predicated region fallthrough
CT: control target
= control target key end

     0   :  { %9 = vsyncpa [#allocation5], 0  ;;  %s1754_s0 = inlined_call_operand.vmem [shape: f32[2,128,128], index: 0, kind: input, shape index: {}]   ;;  %s1755_s1 = inlined_call_operand.vmem [shape: f32[2,128,16], index: 1, kind: input, shape index: {}]   ;;  %s1756_s2 = inlined_call_operand.vmem [shape: f32[16,128], index: 2, kind: input, shape index: {}]   ;;  %s1757_s3 = inlined_call_operand.vmem [shape: f32[1,128], index: 3, kind: input, shape index: {}]   ;;  %s1758_s4 = inlined_call_operand.hbm [shape: f32[2,128,128], index: 4, kind: output, shape index: {}]  }
   0x1   :  { %11 = vsyncpa [#allocation5 + $0x1], 0  ;;  %s1499_s15 = smov 0   ;;  %s1501_s16 = smov 0  }
   0x2   :  { %s1503_s17 = smov 0   ;;  %s1505_s18 = smov 0  }
   0x3   :  { %s1507_s19 = smov 0   ;;  %s1509_s20 = smov 0  }
   0x4 LB: > { %s1131_s21 = sadd.s32 4294967295, %s1468_s20   ;;  %s1132_s22 = sadd.s32 4294967294, %s1468_s20   ;;  %s1468_s20 = sphi %s1509_s20, %s17_s20   ;;  %s1464_s19 = sphi %s1507_s19, %s1765_s19   ;;  %s1460_s18 = sphi %s1505_s18, %s1764_s18   ;;  %s1456_s17 = sphi %s1503_s17, %s1763_s17   ;;  %s1452_s16 = sphi %s1501_s16, %s1762_s16   ;;  %s1448_s15 = sphi %s1499_s15, %s1761_s15  }
   0x5   : > { %s36_s23 = sadd.s32 1, %s1464_s19  ;;  %s145_s24 = sadd.s32 1, %s1456_s17 }
   0x6   : > { %p38_p0 = scmp.ge.s32.totalorder %s36_s23, 2  ;;  %p155_p1 = scmp.ne.s32.totalorder %s1456_s17, %s1452_s16 }
   0x7   : > { %p156_p2 = scmp.eq.s32.totalorder %s1131_s21, 1  ;;  %p161_p3 = scmp.ne.s32.totalorder %s1452_s16, %s1448_s15 }
   0x8   : > { %s1767_s23 = smov (%p38_p0, %s36_s23), 0  ;;  %p162_p5 = scmp.eq.s32.totalorder %s1132_s22, 1 }
   0x9   : > { %p1539_p4 = por %p156_p2, %p155_p1  ;;  %s140_s26 = ssub.s32 %s1464_s19, %s1767_s23 }
   0xa   : > { %p1135_p6 = scmp.ge.s32.totalorder %s1468_s20, 1  ;;  %p143_p7 = scmp.eq.s32.totalorder %s140_s26, 0 }
   0xb   : > { %p1546_p8 = por %p162_p5, %p161_p3  ;;  %p215_p9 = scmp.lt.s32.totalorder %s1468_s20, 3 }
   0xc   : > { %s1552_s28 = scalar_select %p143_p7, %s1456_s17, %s145_s24  }
   0xd   : > { %p216_p10 = pnand %p1135_p6, %p215_p9 }
   0xe   : > { %p258_p11 = scmp.lt.s32.totalorder (!%p216_p10), %s1460_s18, 1  ;;  %s254_s21 = sand.u32 (!%p216_p10), 1, %s1452_s16  }
   0xf   : > { %219 = sbr.rel (%p216_p10) target bundleno = 502 (0x1f6), region = 36  ;;  %s1136_s22 = sshll.u32 (!%p216_p10), %s254_s21, 7 }
  0x14   : > { %s259_s29 = scalar_select %p258_p11, %s1460_s18, 1  ;;  %v682_v32 = vld [vmem:[%s1756_s2 + $0x8] sm:$0xff]  ;;  %v681_v33 = vld [vmem:[%s1756_s2] sm:$0xff]  ;;  %v1470_v34 = vmov 0   ;;  %vm511_vm0 = vcmask 7168   ;;  %vm494_vm1 = vcmask 130048  }
  0x15   : > { %1272 = vmatprep.subr.mxu1 %v682_v32  ;;  %1359 = vset.pattern.permute.xlu1 %v1470_v34 }
  0x16   : > { %s1163_s30 = sshll.u32 %s259_s29, 7  ;;  %1273 = vmatpush3.msra.mxu1 %v682_v32  ;;  %1358 = vset.pattern.permute.xlu0 %v1470_v34  ;;  %s1665_s29 = scalar_lea.vmem [#allocation4], %s1136_s22 }
  0x17   : > { %s1559_s7 = scalar_lea.vmem %s1755_s1, %s1163_s30  ;;  %s1567_s10 = scalar_lea.vmem %s1754_s0, %s1163_s30  ;;  %1274 = vmatprep.subr.mxu1 %v681_v33 }
  0x18   : > { %v312_v0 = vld [vmem:[%s1559_s7 + $0x78] sm:$0xff]  ;;  %v311_v1 = vld [vmem:[%s1559_s7 + $0x70] sm:$0xff]  ;;  %v310_v2 = vld [vmem:[%s1559_s7 + $0x68] sm:$0xff]  ;;  %1275 = vmatpush3.msra.mxu1 %v681_v33  ;;  %s1165_s30 = sshll.u32 %s1460_s18, 11  ;;  %s1028_s5 = sshll.u32 %s1665_s29, 4  ;;  %s1702_s5 = int_to_ptr.vmem [resolvable:$true] %s1028_s5 }
  0x19   : > { %1216 = vmatprep.subr.mxu0 %v312_v0  ;;  %v309_v3 = vld [vmem:[%s1559_s7 + $0x60] sm:$0xff]  ;;  %v308_v5 = vld [vmem:[%s1559_s7 + $0x58] sm:$0xff]  ;;  %v1573_v6 = vld [vmem:[%s1567_s10 + $0x10] sm:$0xff]  ;;  %s1700_s8 = scalar_lea.hbm %s1758_s4, %s1165_s30  ;;  %s1709_s18 = scalar_lea.sflag [#allocation5], %s254_s21 }
  0x1a   : > { %1217 = vmatpush3.msra.mxu0 %v312_v0  ;;  %v281_v4 = vld [vmem:[%s1567_s10] sm:$0xff]  ;;  %v307_v7 = vld [vmem:[%s1559_s7 + $0x50] sm:$0xff]  ;;  %462 = vadd.xlane.f32.xlu1 %v1573_v6  ;;  %v306_v8 = vld [vmem:[%s1559_s7 + $0x48] sm:$0xff]  ;;  %s1392_s9 = scalar_lea.vmem %s1702_s5, 2048 }
  0x1b   : > { %1218 = vmatprep.subr.mxu0 %v311_v1  ;;  %1248 = vmatprep.mubr.f32.mxu0 %v281_v4  ;;  %v282_v9 = vld [vmem:[%s1567_s10 + $0x8] sm:$0xff]  ;;  %v284_v10 = vld [vmem:[%s1567_s10 + $0x18] sm:$0xff]  ;;  %v305_v11 = vld [vmem:[%s1559_s7 + $0x40] sm:$0xff]  ;;  %p1393_p12 = scmp.ne.s32.totalorder %s1702_s5, %s1392_s9 }
  0x1c   : > { %1219 = vmatpush3.msra.mxu0 %v311_v1  ;;  %458 = vadd.xlane.f32.xlu0 %v281_v4  ;;  %v304_v12 = vld [vmem:[%s1559_s7 + $0x38] sm:$0xff]  ;;  %v285_v13 = vld [vmem:[%s1567_s10 + $0x20] sm:$0xff]  ;;  %v286_v14 = vld [vmem:[%s1567_s10 + $0x28] sm:$0xff] }
  0x1d   : > { %1220 = vmatprep.subr.mxu0 %v310_v2  ;;  %v303_v15 = vld [vmem:[%s1559_s7 + $0x30] sm:$0xff]  ;;  %v302_v16 = vld [vmem:[%s1559_s7 + $0x28] sm:$0xff]  ;;  %v288_v18 = vld [vmem:[%s1567_s10 + $0x38] sm:$0xff]  ;;  %p1394_p13 = pnand %p1393_p12, %p1539_p4 }
  0x1e   : > { %1221 = vmatpush3.msra.mxu0 %v310_v2  ;;  %464 = vadd.xlane.f32.xlu1 %v284_v10  ;;  %v287_v17 = vld [vmem:[%s1567_s10 + $0x30] sm:$0xff]  ;;  %v301_v19 = vld [vmem:[%s1559_s7 + $0x20] sm:$0xff]  ;;  %v300_v20 = vld [vmem:[%s1559_s7 + $0x18] sm:$0xff] }
  0x1f   : > { %1222 = vmatprep.subr.mxu0 %v309_v3  ;;  %v289_v21 = vld [vmem:[%s1567_s10 + $0x40] sm:$0xff]  ;;  %v290_v22 = vld [vmem:[%s1567_s10 + $0x48] sm:$0xff]  ;;  %v299_v23 = vld [vmem:[%s1559_s7 + $0x10] sm:$0xff]  ;;  %p1395_p0 = pneg %p1394_p13 }
  0x20   : > { %1223 = vmatpush3.msra.mxu0 %v309_v3  ;;  %460 = vadd.xlane.f32.xlu0 %v282_v9  ;;  %v298_v24 = vld [vmem:[%s1559_s7 + $0x8] sm:$0xff]  ;;  %v291_v25 = vld [vmem:[%s1567_s10 + $0x50] sm:$0xff]  ;;  %v292_v26 = vld [vmem:[%s1567_s10 + $0x58] sm:$0xff] }
  0x21   : > { %1224 = vmatprep.subr.mxu0 %v308_v5  ;;  %v297_v27 = vld [vmem:[%s1559_s7] sm:$0xff]  ;;  %v294_v29 = vld [vmem:[%s1567_s10 + $0x68] sm:$0xff]  ;;  %v295_v30 = vld [vmem:[%s1567_s10 + $0x70] sm:$0xff] }
  0x22   : > { %1225 = vmatpush3.msra.mxu0 %v308_v5  ;;  %468 = vadd.xlane.f32.xlu1 %v286_v14  ;;  %v293_v28 = vld [vmem:[%s1567_s10 + $0x60] sm:$0xff]  ;;  %v296_v31 = vld [vmem:[%s1567_s10 + $0x78] sm:$0xff]  ;;  %s1471_s10 = smov [#allocation4]  }
  0x23   : > { %1226 = vmatprep.subr.mxu0 %v307_v7  ;;  %s1396_s11 = sshll.u32 %s1471_s10, 4  ;;  %s1397_s11 = int_to_ptr.vmem [resolvable:$false] %s1396_s11 }
  0x24   : > { %1227 = vmatpush3.msra.mxu0 %v307_v7  ;;  %466 = vadd.xlane.f32.xlu0 %v285_v13  ;;  %s1398_s12 = scalar_lea.vmem %s1397_s11, 4096  ;;  %p1399_p1 = scmp.lt.s32.totalorder %s1702_s5, %s1397_s11 }
  0x25   : > { %1228 = vmatprep.subr.mxu0 %v306_v8  ;;  %p1400_p2 = scmp.lt.s32.totalorder %s1398_s12, %s1392_s9 }
  0x26   : > { %1229 = vmatpush3.msra.mxu0 %v306_v8  ;;  %472 = vadd.xlane.f32.xlu1 %v288_v18 }
  0x27   : > { %1230 = vmatprep.subr.mxu0 %v305_v11  ;;  %p1401_p3 = por %p1400_p2, %p1399_p1 }
  0x28   : > { %1231 = vmatpush3.msra.mxu0 %v305_v11  ;;  %470 = vadd.xlane.f32.xlu0 %v287_v17 }
  0x29   : > { %1232 = vmatprep.subr.mxu0 %v304_v12  ;;  %p1402_p5 = pnand %p1401_p3, %p1395_p0 }
  0x2a   : > { %1233 = vmatpush3.msra.mxu0 %v304_v12  ;;  %476 = vadd.xlane.f32.xlu1 %v290_v22 }
  0x2b   : > { %1234 = vmatprep.subr.mxu0 %v303_v15 }
  0x2c   : > { %1235 = vmatpush3.msra.mxu0 %v303_v15  ;;  %474 = vadd.xlane.f32.xlu0 %v289_v21 }
  0x2d   : > { %1236 = vmatprep.subr.mxu0 %v302_v16 }
  0x2e   : > { %1237 = vmatpush3.msra.mxu0 %v302_v16  ;;  %480 = vadd.xlane.f32.xlu1 %v292_v26 }
  0x2f   : > { %1238 = vmatprep.subr.mxu0 %v301_v19 }
  0x30   : > { %1239 = vmatpush3.msra.mxu0 %v301_v19  ;;  %478 = vadd.xlane.f32.xlu0 %v291_v25 }
  0x31   : > { %1240 = vmatprep.subr.mxu0 %v300_v20 }
  0x32   : > { %1241 = vmatpush3.msra.mxu0 %v300_v20  ;;  %484 = vadd.xlane.f32.xlu1 %v294_v29 }
  0x33   : > { %1242 = vmatprep.subr.mxu0 %v299_v23 }
  0x34   : > { %1243 = vmatpush3.msra.mxu0 %v299_v23  ;;  %482 = vadd.xlane.f32.xlu0 %v293_v28 }
  0x35   : > { %1244 = vmatprep.subr.mxu0 %v298_v24 }
  0x36   : > { %1245 = vmatpush3.msra.mxu0 %v298_v24  ;;  %488 = vadd.xlane.f32.xlu1 %v296_v31 }
  0x37   : > { %1246 = vmatprep.subr.mxu0 %v297_v27 }
  0x38   : > { %1247 = vmatpush3.msra.mxu0 %v297_v27  ;;  %486 = vadd.xlane.f32.xlu0 %v295_v30 }
  0x39   : > { %1249 = vmatmul.mubr.f32.vlgmr.msra.gmra.mxu0 %v282_v9 }
  0x3a   : > { %1251 = vmatprep.mubr.f32.mxu0 %v1573_v6 }
  0x3d   : > { %1252 = vmatmul.mubr.f32.gmra.mxu0 %v284_v10 }
  0x3e   : > { %1254 = vmatprep.mubr.f32.mxu0 %v285_v13 }
  0x41   : > { %1255 = vmatmul.mubr.f32.gmra.mxu0 %v286_v14 }
  0x42   : > { %1257 = vmatprep.mubr.f32.mxu0 %v287_v17 }
  0x45   : > { %1258 = vmatmul.mubr.f32.gmra.mxu0 %v288_v18 }
  0x46   : > { %1260 = vmatprep.mubr.f32.mxu0 %v289_v21 }
  0x49   : > { %1261 = vmatmul.mubr.f32.gmra.mxu0 %v290_v22 }
  0x4a   : > { %1263 = vmatprep.mubr.f32.mxu0 %v291_v25 }
  0x4d   : > { %1264 = vmatmul.mubr.f32.gmra.mxu0 %v292_v26 }
  0x4e   : > { %1266 = vmatprep.mubr.f32.mxu0 %v293_v28 }
  0x51   : > { %1267 = vmatmul.mubr.f32.gmra.mxu0 %v294_v29 }
  0x52   : > { %1269 = vmatprep.mubr.f32.mxu0 %v295_v30 }
  0x55   : > { %1270 = vmatmul.mubr.f32.gmra.mxu0 %v296_v31 }
  0xa3   : > { %v463_v36 = vpop.xlane.xlu1 %462 }
  0xa4   : > { %514 = vst.msk [vmem:[#allocation3 + $0x10] sm:$0xff] %vm511_vm0, %v463_v36 }
  0xa5   : > { %v459_v35 = vpop.xlane.xlu0 %458 }
  0xa6   : > { %512 = vst.msk [vmem:[#allocation3] sm:$0xff] %vm511_vm0, %v459_v35 }
  0xa7   : > { %v465_v38 = vpop.xlane.xlu1 %464 }
  0xa8   : > { %515 = vst.msk [vmem:[#allocation3 + $0x18] sm:$0xff] %vm511_vm0, %v465_v38 }
  0xa9   : > { %v461_v37 = vpop.xlane.xlu0 %460 }
  0xaa   : > { %513 = vst.msk [vmem:[#allocation3 + $0x8] sm:$0xff] %vm511_vm0, %v461_v37 }
  0xab   : > { %v469_v41 = vpop.xlane.xlu1 %468  ;;  %v635_v44 = vld [vmem:[#allocation3 + $0x10] sm:$0xff] }
  0xac   : > { %517 = vst.msk [vmem:[#allocation3 + $0x28] sm:$0xff] %vm511_vm0, %v469_v41 }
  0xad   : > { %v467_v39 = vpop.xlane.xlu0 %466  ;;  %v633_v40 = vld [vmem:[#allocation3] sm:$0xff] }
  0xae   : > { %516 = vst.msk [vmem:[#allocation3 + $0x20] sm:$0xff] %vm511_vm0, %v467_v39  ;;  %1360 = vrcp.f32 %v633_v40 }
  0xaf   : > { %v473_v45 = vpop.xlane.xlu1 %472  ;;  %v636_v47 = vld [vmem:[#allocation3 + $0x18] sm:$0xff] }
  0xb0   : > { %519 = vst.msk [vmem:[#allocation3 + $0x38] sm:$0xff] %vm511_vm0, %v473_v45 }
  0xb1   : > { %v471_v42 = vpop.xlane.xlu0 %470  ;;  %v634_v43 = vld [vmem:[#allocation3 + $0x8] sm:$0xff] }
  0xb2   : > { %518 = vst.msk [vmem:[#allocation3 + $0x30] sm:$0xff] %vm511_vm0, %v471_v42  ;;  %1362 = vrcp.f32 %v634_v43 }
  0xb3   : > { %1364 = vrcp.f32 %v635_v44  ;;  %v477_v48 = vpop.xlane.xlu1 %476  ;;  %v638_v54 = vld [vmem:[#allocation3 + $0x28] sm:$0xff] }
  0xb4   : > { %521 = vst.msk [vmem:[#allocation3 + $0x48] sm:$0xff] %vm511_vm0, %v477_v48  ;;  %1366 = vrcp.f32 %v636_v47 }
  0xb5   : > { %v475_v46 = vpop.xlane.xlu0 %474  ;;  %v637_v50 = vld [vmem:[#allocation3 + $0x20] sm:$0xff] }
  0xb6   : > { %520 = vst.msk [vmem:[#allocation3 + $0x40] sm:$0xff] %vm511_vm0, %v475_v46  ;;  %1368 = vrcp.f32 %v637_v50 }
  0xb7   : > { %v481_v51 = vpop.xlane.xlu1 %480  ;;  %v640_v0 = vld [vmem:[#allocation3 + $0x38] sm:$0xff] }
  0xb8   : > { %523 = vst.msk [vmem:[#allocation3 + $0x58] sm:$0xff] %vm511_vm0, %v481_v51 }
  0xb9   : > { %v479_v49 = vpop.xlane.xlu0 %478  ;;  %v639_v60 = vld [vmem:[#allocation3 + $0x30] sm:$0xff] }
  0xba   : > { %522 = vst.msk [vmem:[#allocation3 + $0x50] sm:$0xff] %vm511_vm0, %v479_v49 }
  0xbb   : > { %v1361_v52 = vpop.eup %1360  ;;  %v485_v55 = vpop.xlane.xlu1 %484  ;;  %v642_v56 = vld [vmem:[#allocation3 + $0x48] sm:$0xff] }
  0xbc   : > { %879 = vperm.xlu0 %1358, %v1361_v52   ;;  %525 = vst.msk [vmem:[#allocation3 + $0x68] sm:$0xff] %vm511_vm0, %v485_v55  ;;  %1370 = vrcp.f32 %v642_v56 }
  0xbd   : > { %v483_v53 = vpop.xlane.xlu0 %482  ;;  %1372 = vrcp.f32 %v638_v54  ;;  %v641_v3 = vld [vmem:[#allocation3 + $0x40] sm:$0xff] }
  0xbe   : > { %524 = vst.msk [vmem:[#allocation3 + $0x60] sm:$0xff] %vm511_vm0, %v483_v53 }
  0xbf   : > { %v1363_v57 = vpop.eup %1362  ;;  %v489_v61 = vpop.xlane.xlu1 %488  ;;  %v644_v62 = vld [vmem:[#allocation3 + $0x58] sm:$0xff] }
  0xc0   : > { %884 = vperm.xlu1 %1359, %v1363_v57   ;;  %v1365_v58 = vpop.eup %1364  ;;  %527 = vst.msk [vmem:[#allocation3 + $0x78] sm:$0xff] %vm511_vm0, %v489_v61  ;;  %1374 = vrcp.f32 %v644_v62 }
  0xc1   : > { %v487_v59 = vpop.xlane.xlu0 %486  ;;  %1376 = vrcp.f32 %v639_v60  ;;  %v1367_v63 = vpop.eup %1366  ;;  %v643_v7 = vld [vmem:[#allocation3 + $0x50] sm:$0xff] }
  0xc2   : > { %526 = vst.msk [vmem:[#allocation3 + $0x70] sm:$0xff] %vm511_vm0, %v487_v59 }
  0xc3   : > { %v646_v1 = vld [vmem:[#allocation3 + $0x68] sm:$0xff]  ;;  %v1369_v2 = vpop.eup %1368 }
  0xc4   : > { %889 = vperm.xlu1 %1359, %v1365_v58   ;;  %1378 = vrcp.f32 %v646_v1  ;;  %v1662_v58 = vld [vmem:[%s1757_s3] ss:$0 sm:$0xff] }
  0xc5   : > { %1380 = vrcp.f32 %v640_v0  ;;  %v645_v10 = vld [vmem:[#allocation3 + $0x60] sm:$0xff] }
  0xc7   : > { %v648_v4 = vld [vmem:[#allocation3 + $0x78] sm:$0xff] }
  0xc8   : > { %894 = vperm.xlu1 %1359, %v1367_v63   ;;  %1382 = vrcp.f32 %v648_v4 }
  0xc9   : > { %v1371_v5 = vpop.eup %1370  ;;  %1384 = vrcp.f32 %v641_v3  ;;  %v647_v13 = vld [vmem:[#allocation3 + $0x70] sm:$0xff] }
  0xca   : > { %v1373_v6 = vpop.eup %1372  ;;  %924 = vperm.xlu0 %1358, %v1371_v5   ;;  %1386 = vrcp.f32 %v643_v7 }
  0xcb   : > { %1388 = vrcp.f32 %v645_v10 }
  0xcc   : > { %899 = vperm.xlu1 %1359, %v1369_v2   ;;  %1390 = vrcp.f32 %v647_v13 }
  0xcd   : > { %v1375_v8 = vpop.eup %1374 }
  0xce   : > { %v1377_v9 = vpop.eup %1376  ;;  %934 = vperm.xlu0 %1358, %v1375_v8  }
  0xd0   : > { %904 = vperm.xlu1 %1359, %v1373_v6  }
  0xd1   : > { %v1379_v11 = vpop.eup %1378 }
  0xd2   : > { %v1381_v12 = vpop.eup %1380  ;;  %944 = vperm.xlu0 %1358, %v1379_v11  }
  0xd4   : > { %909 = vperm.xlu1 %1359, %v1377_v9  }
  0xd5   : > { %v1383_v14 = vpop.eup %1382 }
  0xd6   : > { %v1385_v15 = vpop.eup %1384  ;;  %954 = vperm.xlu0 %1358, %v1383_v14  }
  0xd7   : > { %v1387_v16 = vpop.eup %1386 }
  0xd8   : > { %914 = vperm.xlu1 %1359, %v1381_v12   ;;  %v1389_v17 = vpop.eup %1388 }
  0xd9   : > { %v1391_v18 = vpop.eup %1390 }
  0xdc   : > { %919 = vperm.xlu1 %1359, %v1385_v15  }
  0xe0   : > { %929 = vperm.xlu1 %1359, %v1387_v16  }
  0xe4   : > { %939 = vperm.xlu1 %1359, %v1389_v17  }
  0xe8   : > { %949 = vperm.xlu1 %1359, %v1391_v18  }
  0xf9   : > { %v1250_v19 = vpop.f32.mrf.mxu0 }
  0xfa   : > { %496 = vst.msk [vmem:[#allocation2 + $0x8] sm:$0xff] %vm494_vm1, %v1250_v19 }
  0xfb   : > { %v379_v20 = vpop.f32.mrf.mxu0 }
  0xfc   : > { %495 = vst.msk [vmem:[#allocation2] sm:$0xff] %vm494_vm1, %v379_v20 }
  0xfd   : > { %v1253_v21 = vpop.f32.mrf.mxu0 }
  0xfe   : > { %498 = vst.msk [vmem:[#allocation2 + $0x18] sm:$0xff] %vm494_vm1, %v1253_v21 }
  0xff   : > { %v389_v22 = vpop.f32.mrf.mxu0 }
 0x100   : > { %497 = vst.msk [vmem:[#allocation2 + $0x10] sm:$0xff] %vm494_vm1, %v389_v22 }
 0x101   : > { %v1256_v23 = vpop.f32.mrf.mxu0  ;;  %v666_v26 = vld [vmem:[#allocation2 + $0x8] sm:$0xff] }
 0x102   : > { %500 = vst.msk [vmem:[#allocation2 + $0x28] sm:$0xff] %vm494_vm1, %v1256_v23 }
 0x103   : > { %v399_v24 = vpop.f32.mrf.mxu0  ;;  %v665_v25 = vld [vmem:[#allocation2] sm:$0xff] }
 0x104   : > { %499 = vst.msk [vmem:[#allocation2 + $0x20] sm:$0xff] %vm494_vm1, %v399_v24  ;;  %1276 = vmatprep.mubr.msk.f32.mxu1 %vm494_vm1, %v665_v25 }
 0x105   : > { %v1259_v27 = vpop.f32.mrf.mxu0  ;;  %1277 = vmatmul.mubr.msk.f32.vlgmr.msra.gmra.mxu1 %vm494_vm1, %v666_v26  ;;  %v668_v30 = vld [vmem:[#allocation2 + $0x18] sm:$0xff] }
 0x106   : > { %502 = vst.msk [vmem:[#allocation2 + $0x38] sm:$0xff] %vm494_vm1, %v1259_v27 }
 0x107   : > { %v409_v28 = vpop.f32.mrf.mxu0  ;;  %v667_v29 = vld [vmem:[#allocation2 + $0x10] sm:$0xff] }
 0x108   : > { %501 = vst.msk [vmem:[#allocation2 + $0x30] sm:$0xff] %vm494_vm1, %v409_v28  ;;  %1279 = vmatprep.mubr.msk.f32.mxu1 %vm494_vm1, %v667_v29 }
 0x109   : > { %v1262_v31 = vpop.f32.mrf.mxu0  ;;  %1280 = vmatmul.mubr.msk.f32.gmra.mxu1 %vm494_vm1, %v668_v30  ;;  %v670_v34 = vld [vmem:[#allocation2 + $0x28] sm:$0xff] }
 0x10a   : > { %504 = vst.msk [vmem:[#allocation2 + $0x48] sm:$0xff] %vm494_vm1, %v1262_v31 }
 0x10b   : > { %v419_v32 = vpop.f32.mrf.mxu0  ;;  %v669_v33 = vld [vmem:[#allocation2 + $0x20] sm:$0xff] }
 0x10c   : > { %503 = vst.msk [vmem:[#allocation2 + $0x40] sm:$0xff] %vm494_vm1, %v419_v32  ;;  %1282 = vmatprep.mubr.msk.f32.mxu1 %vm494_vm1, %v669_v33 }
 0x10d   : > { %v1265_v35 = vpop.f32.mrf.mxu0  ;;  %1283 = vmatmul.mubr.msk.f32.gmra.mxu1 %vm494_vm1, %v670_v34  ;;  %v672_v38 = vld [vmem:[#allocation2 + $0x38] sm:$0xff] }
 0x10e   : > { %506 = vst.msk [vmem:[#allocation2 + $0x58] sm:$0xff] %vm494_vm1, %v1265_v35 }
 0x10f   : > { %v429_v36 = vpop.f32.mrf.mxu0  ;;  %v671_v37 = vld [vmem:[#allocation2 + $0x30] sm:$0xff] }
 0x110   : > { %505 = vst.msk [vmem:[#allocation2 + $0x50] sm:$0xff] %vm494_vm1, %v429_v36  ;;  %1285 = vmatprep.mubr.msk.f32.mxu1 %vm494_vm1, %v671_v37 }
 0x111   : > { %v1268_v39 = vpop.f32.mrf.mxu0  ;;  %1286 = vmatmul.mubr.msk.f32.gmra.mxu1 %vm494_vm1, %v672_v38  ;;  %v674_v42 = vld [vmem:[#allocation2 + $0x48] sm:$0xff] }
 0x112   : > { %508 = vst.msk [vmem:[#allocation2 + $0x68] sm:$0xff] %vm494_vm1, %v1268_v39 }
 0x113   : > { %v439_v40 = vpop.f32.mrf.mxu0  ;;  %v673_v41 = vld [vmem:[#allocation2 + $0x40] sm:$0xff] }
 0x114   : > { %507 = vst.msk [vmem:[#allocation2 + $0x60] sm:$0xff] %vm494_vm1, %v439_v40  ;;  %1288 = vmatprep.mubr.msk.f32.mxu1 %vm494_vm1, %v673_v41 }
 0x115   : > { %v1271_v43 = vpop.f32.mrf.mxu0  ;;  %1289 = vmatmul.mubr.msk.f32.gmra.mxu1 %vm494_vm1, %v674_v42  ;;  %v676_v46 = vld [vmem:[#allocation2 + $0x58] sm:$0xff] }
 0x116   : > { %510 = vst.msk [vmem:[#allocation2 + $0x78] sm:$0xff] %vm494_vm1, %v1271_v43 }
 0x117   : > { %v449_v44 = vpop.f32.mrf.mxu0  ;;  %v675_v45 = vld [vmem:[#allocation2 + $0x50] sm:$0xff] }
 0x118   : > { %509 = vst.msk [vmem:[#allocation2 + $0x70] sm:$0xff] %vm494_vm1, %v449_v44  ;;  %1291 = vmatprep.mubr.msk.f32.mxu1 %vm494_vm1, %v675_v45 }
 0x119   : > { %1292 = vmatmul.mubr.msk.f32.gmra.mxu1 %vm494_vm1, %v676_v46  ;;  %v678_v48 = vld [vmem:[#allocation2 + $0x68] sm:$0xff] }
 0x11b   : > { %v677_v47 = vld [vmem:[#allocation2 + $0x60] sm:$0xff] }
 0x11c   : > { %1294 = vmatprep.mubr.msk.f32.mxu1 %vm494_vm1, %v677_v47 }
 0x11d   : > { %1295 = vmatmul.mubr.msk.f32.gmra.mxu1 %vm494_vm1, %v678_v48  ;;  %v680_v50 = vld [vmem:[#allocation2 + $0x78] sm:$0xff] }
 0x11f   : > { %v679_v49 = vld [vmem:[#allocation2 + $0x70] sm:$0xff] }
 0x120   : > { %1297 = vmatprep.mubr.msk.f32.mxu1 %vm494_vm1, %v679_v49 }
 0x121   : > { %1298 = vmatmul.mubr.msk.f32.gmra.mxu1 %vm494_vm1, %v680_v50 }
 0x137   : > { %v880_v60 = vpop.permute.xlu0 %879 }
 0x13b   : > { %v885_v51 = vpop.permute.xlu1 %884 }
 0x13f   : > { %v890_v52 = vpop.permute.xlu1 %889 }
 0x143   : > { %v895_v53 = vpop.permute.xlu1 %894 }
 0x145   : > { %v925_v10 = vpop.permute.xlu0 %924 }
 0x147   : > { %v900_v54 = vpop.permute.xlu1 %899 }
 0x149   : > { %v935_v21 = vpop.permute.xlu0 %934 }
 0x14b   : > { %v905_v55 = vpop.permute.xlu1 %904 }
 0x14d   : > { %v945_v32 = vpop.permute.xlu0 %944 }
 0x14f   : > { %v910_v56 = vpop.permute.xlu1 %909 }
 0x151   : > { %v955_v43 = vpop.permute.xlu0 %954 }
 0x153   : > { %v915_v3 = vpop.permute.xlu1 %914 }
 0x157   : > { %v920_v14 = vpop.permute.xlu1 %919 }
 0x15b   : > { %v930_v25 = vpop.permute.xlu1 %929 }
 0x15f   : > { %v940_v36 = vpop.permute.xlu1 %939 }
 0x163   : > { %v950_v47 = vpop.permute.xlu1 %949 }
 0x1c5   : > { %v1278_v57 = vpop.f32.mrf.mxu1 }
 0x1c6   : > { %v958_v59 = vmul.f32 %v1278_v57, %v885_v51 }
 0x1c7   : > { %v798_v61 = vpop.f32.mrf.mxu1 }
 0x1c8   : > { %v981_v62 = vadd.f32 %v1662_v58, %v958_v59  ;;  %v957_v63 = vmul.f32 %v880_v60, %v798_v61 }
 0x1c9   : > { %v1281_v0 = vpop.f32.mrf.mxu1 }
 0x1ca   : > { %997 = vst [vmem:[%s1665_s29 + $0x8] sm:$0xff] %v981_v62  ;;  %v980_v1 = vadd.f32 %v1662_v58, %v957_v63  ;;  %v960_v2 = vmul.f32 %v1281_v0, %v895_v53 }
 0x1cb   : > { %v808_v4 = vpop.f32.mrf.mxu1 }
 0x1cc   : > { %996 = vst [vmem:[%s1665_s29] sm:$0xff] %v980_v1  ;;  %v983_v5 = vadd.f32 %v1662_v58, %v960_v2  ;;  %v959_v6 = vmul.f32 %v890_v52, %v808_v4 }
 0x1cd   : > { %v1284_v7 = vpop.f32.mrf.mxu1 }
 0x1ce   : > { %999 = vst [vmem:[%s1665_s29 + $0x18] sm:$0xff] %v983_v5  ;;  %v982_v8 = vadd.f32 %v1662_v58, %v959_v6  ;;  %v962_v9 = vmul.f32 %v1284_v7, %v905_v55 }
 0x1cf   : > { %v818_v11 = vpop.f32.mrf.mxu1 }
 0x1d0   : > { %998 = vst [vmem:[%s1665_s29 + $0x10] sm:$0xff] %v982_v8  ;;  %v985_v12 = vadd.f32 %v1662_v58, %v962_v9  ;;  %v961_v13 = vmul.f32 %v900_v54, %v818_v11 }
 0x1d1   : > { %v1287_v15 = vpop.f32.mrf.mxu1 }
 0x1d2   : > { %1001 = vst [vmem:[%s1665_s29 + $0x28] sm:$0xff] %v985_v12  ;;  %v984_v16 = vadd.f32 %v1662_v58, %v961_v13  ;;  %v964_v17 = vmul.f32 %v1287_v15, %v915_v3 }
 0x1d3   : > { %v828_v18 = vpop.f32.mrf.mxu1 }
 0x1d4   : > { %1000 = vst [vmem:[%s1665_s29 + $0x20] sm:$0xff] %v984_v16  ;;  %v987_v19 = vadd.f32 %v1662_v58, %v964_v17  ;;  %v963_v20 = vmul.f32 %v910_v56, %v828_v18 }
 0x1d5   : > { %v1290_v22 = vpop.f32.mrf.mxu1 }
 0x1d6   : > { %1003 = vst [vmem:[%s1665_s29 + $0x38] sm:$0xff] %v987_v19  ;;  %v986_v23 = vadd.f32 %v1662_v58, %v963_v20  ;;  %v966_v24 = vmul.f32 %v1290_v22, %v925_v10 }
 0x1d7   : > { %v838_v26 = vpop.f32.mrf.mxu1 }
 0x1d8   : > { %1002 = vst [vmem:[%s1665_s29 + $0x30] sm:$0xff] %v986_v23  ;;  %v989_v27 = vadd.f32 %v1662_v58, %v966_v24  ;;  %v965_v28 = vmul.f32 %v920_v14, %v838_v26 }
 0x1d9   : > { %v1293_v29 = vpop.f32.mrf.mxu1 }
 0x1da   : > { %1005 = vst [vmem:[%s1665_s29 + $0x48] sm:$0xff] %v989_v27  ;;  %v988_v30 = vadd.f32 %v1662_v58, %v965_v28  ;;  %v968_v31 = vmul.f32 %v1293_v29, %v935_v21 }
 0x1db   : > { %v848_v33 = vpop.f32.mrf.mxu1 }
 0x1dc   : > { %1004 = vst [vmem:[%s1665_s29 + $0x40] sm:$0xff] %v988_v30  ;;  %v991_v34 = vadd.f32 %v1662_v58, %v968_v31  ;;  %v967_v35 = vmul.f32 %v930_v25, %v848_v33 }
 0x1dd   : > { %v1296_v37 = vpop.f32.mrf.mxu1 }
 0x1de   : > { %1007 = vst [vmem:[%s1665_s29 + $0x58] sm:$0xff] %v991_v34  ;;  %v990_v38 = vadd.f32 %v1662_v58, %v967_v35  ;;  %v970_v39 = vmul.f32 %v1296_v37, %v945_v32 }
 0x1df   : > { %v858_v40 = vpop.f32.mrf.mxu1 }
 0x1e0   : > { %1006 = vst [vmem:[%s1665_s29 + $0x50] sm:$0xff] %v990_v38  ;;  %v993_v41 = vadd.f32 %v1662_v58, %v970_v39  ;;  %v969_v42 = vmul.f32 %v940_v36, %v858_v40 }
 0x1e1   : > { %v1299_v44 = vpop.f32.mrf.mxu1 }
 0x1e2   : > { %1009 = vst [vmem:[%s1665_s29 + $0x68] sm:$0xff] %v993_v41  ;;  %v992_v45 = vadd.f32 %v1662_v58, %v969_v42  ;;  %v972_v46 = vmul.f32 %v1299_v44, %v955_v43 }
 0x1e3   : > { %v868_v48 = vpop.f32.mrf.mxu1 }
 0x1e4   : > { %1008 = vst [vmem:[%s1665_s29 + $0x60] sm:$0xff] %v992_v45  ;;  %v995_v49 = vadd.f32 %v1662_v58, %v972_v46  ;;  %v971_v50 = vmul.f32 %v950_v47, %v868_v48 }
 0x1e6   : > { %1011 = vst [vmem:[%s1665_s29 + $0x78] sm:$0xff] %v995_v49  ;;  %v994_v51 = vadd.f32 %v1662_v58, %v971_v50 }
 0x1e8   : > { %1010 = vst [vmem:[%s1665_s29 + $0x70] sm:$0xff] %v994_v51 }
 0x1e9   : > { %1405 = shalt.err (!%p1402_p5)
}
 0x1ea   : > { %s1406_s13 = scalar_lea.hbm %s1700_s8, 2048  ;;  %s1410_s22 = scalar_lea.hbm %s1758_s4, 4096 }
 0x1eb   : > { %p1407_p6 = scmp.ne.s32.totalorder %s1700_s8, %s1406_s13  ;;  %p1411_p10 = scmp.lt.s32.totalorder %s1700_s8, %s1758_s4 }
 0x1ec   : > { %p1412_p11 = scmp.lt.s32.totalorder %s1410_s22, %s1406_s13 }
 0x1ed   : > { %p1408_p7 = pnand %p1407_p6, %p1539_p4 }
 0x1ee   : > { %p1413_p12 = por %p1412_p11, %p1411_p10 }
 0x1ef   : > { %p1409_p9 = pneg %p1408_p7 }
 0x1f1   : > { %p1414_p13 = pnand %p1413_p12, %p1409_p9 }
 0x1f3   : > { %1417 = shalt.err (!%p1414_p13)
}
 0x1f4   : > { %s1472_s29 = smov 128   ;;  %s1473_s30 = smov 8  }
 0x1f5   : > { %1300 = dma.vmem_to_hbm [thread:$0]  (%p1539_p4), %s1702_s5, 2048, %s1700_s8, %s1709_s18, %s1472_s29, %s1472_s29, %s1473_s30  }
 0x1f6 PF: > { %p1306_p0 = scmp.ge.s32.totalorder %s1468_s20, 2  ;;  %s1043_s6 = sand.u32 1, %s1448_s15  }
 0x1f7   : > { %s1044_s7 = scalar_lea.sflag [#allocation5], %s1043_s6 }
 0x1f8   : > { %p1303_p1 = pnand %p1306_p0, %p1546_p8 }
 0x1fa   : > { %p1304_p2 = pneg %p1303_p1 }
 0x1fc   : > { %1443 = dma.done.wait (%p1304_p2), %s1044_s7, 2048  }
 0x1fd   : > { %1445 = vsyncadd (%p1304_p2), %s1044_s7, 4294965248  ;;  %s17_s20 = sadd.s32 1, %s1468_s20   ;;  %s1761_s15 = smov %s1452_s16 }
 0x1fe   : > { %p14_p3 = scmp.ge.s32.totalorder %s17_s20, 4   ;;  %s1762_s16 = smov %s1456_s17 }
 0x1ff   : > { %s1763_s17 = smov %s1552_s28  ;;  %s1764_s18 = smov %s1464_s19 }
 0x200   : > { %s1765_s19 = smov %s1767_s23  ;;  %16 = sbr.rel (!%p14_p3) target bundleno = 4 (0x4), region = 86 }
 0x205   :  { %1049 = vsyncpa [#allocation5], 1 }
 0x206   :  { %1051 = vsyncpa [#allocation5 + $0x1], 1 }

</bundles_post_ra>
